<compile_context>
chip_gen: v5e
topology: v5e:2x2
jax: 0.10.0
libtpu: 0.0.40
codegen_flags: <defaults>
</compile_context>

<pallas_src>
import jax
import jax.numpy as jnp
from jax.experimental import pallas as pl
from jax.experimental.pallas import tpu as pltpu


def gcr_kernel(x_ref, w_ref, b_ref, o_ref, acc_ref):
    # x_ref:   (block_n, tile_hw, C)   current spatial tile, C lane-dense
    # w_ref:   (C, OUT)                weight already scaled by 1/(H*W)
    # b_ref:   (1, OUT)                bias
    # o_ref:   (block_n, OUT)          output (resident across the k axis)
    # acc_ref: (block_n, C) f32        running spatial sum
    k = pl.program_id(1)

    @pl.when(k == 0)
    def _():
        acc_ref[...] = jnp.zeros_like(acc_ref)

    # Running SUM over the spatial tile (scale by 1/HW is folded into w).
    acc_ref[...] += jnp.sum(x_ref[...].astype(jnp.float32), axis=1)

    @pl.when(k == pl.num_programs(1) - 1)
    def _():
        # 1x1 conv == matmul on the pooled features; issued once, in finalize.
        y = jnp.dot(acc_ref[...], w_ref[...], preferred_element_type=jnp.float32)
        o_ref[...] = (y + b_ref[...]).astype(o_ref.dtype)


def net_gcr_simple_forward(x_nchw, weight, bias, *, max_tile_hw=512):
    """x_nchw: (N, 512, H, W); weight: (OUT, 512, 1, 1); bias: (OUT,)."""
    N, C, H, W = x_nchw.shape
    OUT = weight.shape[0]
    hw = H * W

    # C-last layout: (N, HW, C) so C=512 maps to the lane dimension.
    x_nlc = jnp.transpose(x_nchw, (0, 2, 3, 1)).reshape(N, hw, C)

    # Spatial tile for the reduction grid; zero-pad (sum-safe) if needed.
    tile_hw = hw if hw <= max_tile_hw else max_tile_hw
    n_hw_blocks = pl.cdiv(hw, tile_hw)
    hw_padded = n_hw_blocks * tile_hw
    if hw_padded != hw:
        x_nlc = jnp.pad(x_nlc, ((0, 0), (0, hw_padded - hw), (0, 0)))

    # Batch tile: 8-row blocks keep the output block legal; otherwise full N.
    block_n = 8 if (N % 8 == 0) else N
    n_n_blocks = N // block_n

    # Fold the 1/(H*W) average-pool scale into the weight so the inner loop
    # is purely load + add.
    w_scaled = (weight.reshape(OUT, C).T / float(hw)).astype(jnp.float32)  # (C, OUT)
    b2 = bias.reshape(1, OUT).astype(jnp.float32)

    # Explicit VMEM budget (double-buffered x tile + params + accumulator),
    # sized to stay well within v7x's 64 MiB physical VMEM.
    x_itemsize = jnp.dtype(x_nlc.dtype).itemsize
    vmem_bytes = (2 * block_n * tile_hw * C * x_itemsize   # double-buffered x
                  + C * OUT * 4 + OUT * 4                  # weight + bias
                  + block_n * C * 4 + block_n * OUT * 4)   # accumulator + out
    vmem_limit = min(max(2 * int(vmem_bytes) + (4 << 20), 16 << 20), 64 << 20)

    return pl.pallas_call(
        gcr_kernel,
        out_shape=jax.ShapeDtypeStruct((N, OUT), x_nchw.dtype),
        grid_spec=pltpu.PrefetchScalarGridSpec(
            num_scalar_prefetch=0,
            grid=(n_n_blocks, n_hw_blocks),                 # reduction axis last
            in_specs=[
                pl.BlockSpec((block_n, tile_hw, C), lambda n, k: (n, k, 0)),
                pl.BlockSpec((C, OUT), lambda n, k: (0, 0)),
                pl.BlockSpec((1, OUT), lambda n, k: (0, 0)),
            ],
            out_specs=pl.BlockSpec((block_n, OUT), lambda n, k: (n, 0)),
            scratch_shapes=[pltpu.VMEM((block_n, C), jnp.float32)],
        ),
        compiler_params=pltpu.CompilerParams(
            dimension_semantics=("parallel", "arbitrary"),
            vmem_limit_bytes=vmem_limit,
        ),
    )(x_nlc, w_scaled, b2)


def _reference(x, weight, bias):
    OUT, C = weight.shape[0], weight.shape[1]
    return jnp.mean(x, axis=(2, 3)) @ weight.reshape(OUT, C).T + bias


if __name__ == "__main__":
    key = jax.random.PRNGKey(0)
    kx, kw, kb, kx2 = jax.random.split(key, 4)

    # Module fixes in_channels = 512; keep spatial & out_channels small.
    N, C, H, W = 2, 512, 8, 8
    OUT = 32

    x = jax.random.normal(kx, (N, C, H, W), dtype=jnp.float32)

    # Deterministic parameter init matching nn.Conv2d's default (uniform in
    # [-1/sqrt(fan_in), 1/sqrt(fan_in)]), fan_in = 512 * 1 * 1.
    bound = 1.0 / (C ** 0.5)
    weight = jax.random.uniform(kw, (OUT, C, 1, 1),
                                minval=-bound, maxval=bound, dtype=jnp.float32)
    bias = jax.random.uniform(kb, (OUT,),
                              minval=-bound, maxval=bound, dtype=jnp.float32)

    # Small single-tile case.
    out = jax.block_until_ready(net_gcr_simple_forward(x, weight, bias))
    ref = _reference(x, weight, bias)
    assert out.shape == (N, OUT)
    assert jnp.allclose(out, ref, atol=1e-4, rtol=1e-4)

    # Multi-tile + padding case (HW = 900 > 512, padded to 1024).
    H2, W2 = 30, 30
    x2 = jax.random.normal(kx2, (N, C, H2, W2), dtype=jnp.float32)
    out2 = jax.block_until_ready(net_gcr_simple_forward(x2, weight, bias))
    ref2 = _reference(x2, weight, bias)
    assert out2.shape == (N, OUT)
    assert jnp.allclose(out2, ref2, atol=1e-4, rtol=1e-4)

    print("KERNEL_OK")
</pallas_src>

<mosaic_0001>
module attributes {stable_mosaic.version = 11 : i64} {
  func.func @gcr_kernel(%arg0: i32, %arg1: i32, %arg2: memref<2x64x512xf32, #tpu.memory_space<vmem>>, %arg3: memref<512x32xf32, #tpu.memory_space<vmem>>, %arg4: memref<1x32xf32, #tpu.memory_space<vmem>>, %arg5: memref<2x32xf32, #tpu.memory_space<vmem>>, %arg6: memref<2x512xf32, #tpu.memory_space<vmem>>) attributes {dimension_semantics = [#tpu.dimension_semantics<parallel>, #tpu.dimension_semantics<arbitrary>], iteration_bounds = array<i64: 1, 1>, scalar_prefetch = 0 : i64, scratch_operands = 1 : i64, tpu.core_type = #tpu.core_type<tc>, window_params = [{transform_indices = @transform_0, window_bounds = array<i64: 2, 64, 512>}, {pipeline_mode = #tpu.pipeline_mode<synchronous>, transform_indices = @transform_1, window_bounds = array<i64: 512, 32>}, {pipeline_mode = #tpu.pipeline_mode<synchronous>, transform_indices = @transform_2, window_bounds = array<i64: 1, 32>}, {transform_indices = @transform_3, window_bounds = array<i64: 2, 32>}]} {
    %c0_i32 = arith.constant 0 : i32
    %0 = arith.cmpi eq, %arg1, %c0_i32 : i32
    %1 = arith.extui %0 : i1 to i32
    %c0_i32_0 = arith.constant 0 : i32
    %2 = arith.cmpi ne, %1, %c0_i32_0 : i32
    scf.if %2 {
      %cst_9 = arith.constant 0.000000e+00 : f32
      %11 = vector.broadcast %cst_9 : f32 to vector<2x512xf32>
      %c0_10 = arith.constant 0 : index
      %c0_11 = arith.constant 0 : index
      %12 = vector.load %arg6[%c0_10, %c0_11] : memref<2x512xf32, #tpu.memory_space<vmem>>, vector<2x512xf32>
      tpu.vector_store %arg6[%c0_10, %c0_11], %11 {strides = array<i32>} : memref<2x512xf32, #tpu.memory_space<vmem>>, vector<2x512xf32>,
    } else {
    }
    %c0 = arith.constant 0 : index
    %c0_1 = arith.constant 0 : index
    %3 = vector.load %arg6[%c0, %c0_1] : memref<2x512xf32, #tpu.memory_space<vmem>>, vector<2x512xf32>
    %c0_2 = arith.constant 0 : index
    %c0_3 = arith.constant 0 : index
    %c0_4 = arith.constant 0 : index
    %4 = vector.load %arg2[%c0_2, %c0_3, %c0_4] : memref<2x64x512xf32, #tpu.memory_space<vmem>>, vector<2x64x512xf32>
    %cst = arith.constant dense<0.000000e+00> : vector<2x512xf32>
    %5 = vector.multi_reduction <add>, %4, %cst [1] : vector<2x64x512xf32> to vector<2x512xf32>
    %6 = arith.addf %3, %5 : vector<2x512xf32>
    %c0_5 = arith.constant 0 : index
    %c0_6 = arith.constant 0 : index
    %7 = vector.load %arg6[%c0_5, %c0_6] : memref<2x512xf32, #tpu.memory_space<vmem>>, vector<2x512xf32>
    tpu.vector_store %arg6[%c0_5, %c0_6], %6 {strides = array<i32>} : memref<2x512xf32, #tpu.memory_space<vmem>>, vector<2x512xf32>,
    %c0_i32_7 = arith.constant 0 : i32
    %8 = arith.cmpi eq, %arg1, %c0_i32_7 : i32
    %9 = arith.extui %8 : i1 to i32
    %c0_i32_8 = arith.constant 0 : i32
    %10 = arith.cmpi ne, %9, %c0_i32_8 : i32
    scf.if %10 {
      %c0_9 = arith.constant 0 : index
      %c0_10 = arith.constant 0 : index
      %11 = vector.load %arg6[%c0_9, %c0_10] : memref<2x512xf32, #tpu.memory_space<vmem>>, vector<2x512xf32>
      %c0_11 = arith.constant 0 : index
      %c0_12 = arith.constant 0 : index
      %12 = vector.load %arg3[%c0_11, %c0_12] : memref<512x32xf32, #tpu.memory_space<vmem>>, vector<512x32xf32>
      %cst_13 = arith.constant dense<0.000000e+00> : vector<2x32xf32>
      %13 = tpu.matmul %11, %12, %cst_13 {dimension_numbers = #tpu.dot_dimension_numbers<[1], [0], [0], [1], [0, 0, 1, 1], [], []>} : vector<2x512xf32>, vector<512x32xf32>, vector<2x32xf32> -> vector<2x32xf32>
      %c0_14 = arith.constant 0 : index
      %c0_15 = arith.constant 0 : index
      %14 = vector.load %arg4[%c0_14, %c0_15] : memref<1x32xf32, #tpu.memory_space<vmem>>, vector<1x32xf32>
      %15 = vector.broadcast %14 : vector<1x32xf32> to vector<2x32xf32>
      %16 = arith.addf %13, %15 : vector<2x32xf32>
      %c0_16 = arith.constant 0 : index
      %c0_17 = arith.constant 0 : index
      %17 = vector.load %arg5[%c0_16, %c0_17] : memref<2x32xf32, #tpu.memory_space<vmem>>, vector<2x32xf32>
      tpu.vector_store %arg5[%c0_16, %c0_17], %16 {strides = array<i32>} : memref<2x32xf32, #tpu.memory_space<vmem>>, vector<2x32xf32>,
    } else {
    }
    return
  }
  func.func @transform_0(%arg0: i32, %arg1: i32) -> (i32, i32, i32) {
    %c0_i32 = arith.constant 0 : i32
    %c0_i32_0 = arith.constant 0 : i32
    return %arg0, %arg1, %c0_i32 : i32, i32, i32
  }
  func.func @transform_1(%arg0: i32, %arg1: i32) -> (i32, i32) {
    %c0_i32 = arith.constant 0 : i32
    %c0_i32_0 = arith.constant 0 : i32
    %c0_i32_1 = arith.constant 0 : i32
    return %c0_i32, %c0_i32_0 : i32, i32
  }
  func.func @transform_2(%arg0: i32, %arg1: i32) -> (i32, i32) {
    %c0_i32 = arith.constant 0 : i32
    %c0_i32_0 = arith.constant 0 : i32
    %c0_i32_1 = arith.constant 0 : i32
    return %c0_i32, %c0_i32_0 : i32, i32
  }
  func.func @transform_3(%arg0: i32, %arg1: i32) -> (i32, i32) {
    %c0_i32 = arith.constant 0 : i32
    %c0_i32_0 = arith.constant 0 : i32
    return %arg0, %c0_i32 : i32, i32
  }
}

</mosaic_0001>

<bundles_post_ra>
// kernel: tpu_custom_call.1
= control target key start
LH: loop header
LB: loop body
LE: loop exit
PB: predicated region body
PF: predicated region fallthrough
CT: control target
= control target key end

     0   :  { %s847_s0 = inlined_call_operand.vmem [shape: f32[2,64,512], index: 0, kind: input, shape index: {}]   ;;  %s848_s1 = inlined_call_operand.vmem [shape: f32[512,32], index: 1, kind: input, shape index: {}]   ;;  %s849_s2 = inlined_call_operand.vmem [shape: f32[1,32], index: 2, kind: input, shape index: {}]   ;;  %s850_s3 = inlined_call_operand.hbm [shape: f32[2,32], index: 3, kind: output, shape index: {}]  }
   0x1   :  { %v279_v0 = vld [vmem:[%s848_s1 + $0x178] sm:$0xff]  ;;  %v278_v2 = vld [vmem:[%s848_s1 + $0x170] sm:$0xff]  ;;  %v277_v6 = vld [vmem:[%s848_s1 + $0x168] sm:$0xff] }
   0x2   :  { %v247_v1 = vld [vmem:[%s848_s1 + $0x78] sm:$0xff]  ;;  %350 = vmatpush.msra.mxu2 %v279_v0  ;;  %v246_v4 = vld [vmem:[%s848_s1 + $0x70] sm:$0xff]  ;;  %v245_v8 = vld [vmem:[%s848_s1 + $0x68] sm:$0xff] }
   0x3   :  { %310 = vmatpush.msra.mxu0 %v247_v1  ;;  %v295_v3 = vld [vmem:[%s848_s1 + $0x1f8] sm:$0xff]  ;;  %v294_v7 = vld [vmem:[%s848_s1 + $0x1f0] sm:$0xff]  ;;  %v293_v10 = vld [vmem:[%s848_s1 + $0x1e8] sm:$0xff] }
   0x4   :  { %v263_v5 = vld [vmem:[%s848_s1 + $0xf8] sm:$0xff]  ;;  %370 = vmatpush.msra.mxu3 %v295_v3  ;;  %351 = vmatpush.msra.mxu2 %v278_v2  ;;  %v262_v9 = vld [vmem:[%s848_s1 + $0xf0] sm:$0xff]  ;;  %v276_v11 = vld [vmem:[%s848_s1 + $0x160] sm:$0xff] }
   0x5   :  { %330 = vmatpush.msra.mxu1 %v263_v5  ;;  %311 = vmatpush.msra.mxu0 %v246_v4  ;;  %v244_v12 = vld [vmem:[%s848_s1 + $0x60] sm:$0xff]  ;;  %v261_v13 = vld [vmem:[%s848_s1 + $0xe8] sm:$0xff]  ;;  %v275_v16 = vld [vmem:[%s848_s1 + $0x158] sm:$0xff] }
   0x6   :  { %371 = vmatpush.msra.mxu3 %v294_v7  ;;  %352 = vmatpush.msra.mxu2 %v277_v6  ;;  %v292_v14 = vld [vmem:[%s848_s1 + $0x1e0] sm:$0xff]  ;;  %v243_v17 = vld [vmem:[%s848_s1 + $0x58] sm:$0xff]  ;;  %v274_v20 = vld [vmem:[%s848_s1 + $0x150] sm:$0xff] }
   0x7   :  { %331 = vmatpush.msra.mxu1 %v262_v9  ;;  %312 = vmatpush.msra.mxu0 %v245_v8  ;;  %v260_v15 = vld [vmem:[%s848_s1 + $0xe0] sm:$0xff]  ;;  %v291_v18 = vld [vmem:[%s848_s1 + $0x1d8] sm:$0xff]  ;;  %v242_v21 = vld [vmem:[%s848_s1 + $0x50] sm:$0xff] }
   0x8   :  { %372 = vmatpush.msra.mxu3 %v293_v10  ;;  %353 = vmatpush.msra.mxu2 %v276_v11  ;;  %v259_v19 = vld [vmem:[%s848_s1 + $0xd8] sm:$0xff]  ;;  %v290_v22 = vld [vmem:[%s848_s1 + $0x1d0] sm:$0xff]  ;;  %v273_v24 = vld [vmem:[%s848_s1 + $0x148] sm:$0xff] }
   0x9   :  { %332 = vmatpush.msra.mxu1 %v261_v13  ;;  %313 = vmatpush.msra.mxu0 %v244_v12  ;;  %v258_v23 = vld [vmem:[%s848_s1 + $0xd0] sm:$0xff]  ;;  %v241_v25 = vld [vmem:[%s848_s1 + $0x48] sm:$0xff]  ;;  %v272_v28 = vld [vmem:[%s848_s1 + $0x140] sm:$0xff] }
   0xa   :  { %373 = vmatpush.msra.mxu3 %v292_v14  ;;  %354 = vmatpush.msra.mxu2 %v275_v16  ;;  %v289_v26 = vld [vmem:[%s848_s1 + $0x1c8] sm:$0xff]  ;;  %v240_v29 = vld [vmem:[%s848_s1 + $0x40] sm:$0xff]  ;;  %v271_v32 = vld [vmem:[%s848_s1 + $0x138] sm:$0xff] }
   0xb   :  { %333 = vmatpush.msra.mxu1 %v260_v15  ;;  %314 = vmatpush.msra.mxu0 %v243_v17  ;;  %v257_v27 = vld [vmem:[%s848_s1 + $0xc8] sm:$0xff]  ;;  %v288_v30 = vld [vmem:[%s848_s1 + $0x1c0] sm:$0xff]  ;;  %v239_v33 = vld [vmem:[%s848_s1 + $0x38] sm:$0xff] }
   0xc   :  { %374 = vmatpush.msra.mxu3 %v291_v18  ;;  %355 = vmatpush.msra.mxu2 %v274_v20  ;;  %v256_v31 = vld [vmem:[%s848_s1 + $0xc0] sm:$0xff]  ;;  %v287_v34 = vld [vmem:[%s848_s1 + $0x1b8] sm:$0xff]  ;;  %v270_v36 = vld [vmem:[%s848_s1 + $0x130] sm:$0xff] }
   0xd   :  { %334 = vmatpush.msra.mxu1 %v259_v19  ;;  %315 = vmatpush.msra.mxu0 %v242_v21  ;;  %v255_v35 = vld [vmem:[%s848_s1 + $0xb8] sm:$0xff]  ;;  %v238_v37 = vld [vmem:[%s848_s1 + $0x30] sm:$0xff]  ;;  %v269_v38 = vld [vmem:[%s848_s1 + $0x128] sm:$0xff] }
   0xe   :  { %375 = vmatpush.msra.mxu3 %v290_v22  ;;  %356 = vmatpush.msra.mxu2 %v273_v24  ;;  %v286_v39 = vld [vmem:[%s848_s1 + $0x1b0] sm:$0xff]  ;;  %v237_v40 = vld [vmem:[%s848_s1 + $0x28] sm:$0xff]  ;;  %v268_v42 = vld [vmem:[%s848_s1 + $0x120] sm:$0xff] }
   0xf   :  { %335 = vmatpush.msra.mxu1 %v258_v23  ;;  %316 = vmatpush.msra.mxu0 %v241_v25  ;;  %v254_v41 = vld [vmem:[%s848_s1 + $0xb0] sm:$0xff]  ;;  %v285_v43 = vld [vmem:[%s848_s1 + $0x1a8] sm:$0xff]  ;;  %v236_v44 = vld [vmem:[%s848_s1 + $0x20] sm:$0xff] }
  0x10   :  { %376 = vmatpush.msra.mxu3 %v289_v26  ;;  %357 = vmatpush.msra.mxu2 %v272_v28  ;;  %v253_v45 = vld [vmem:[%s848_s1 + $0xa8] sm:$0xff]  ;;  %v284_v46 = vld [vmem:[%s848_s1 + $0x1a0] sm:$0xff]  ;;  %v267_v48 = vld [vmem:[%s848_s1 + $0x118] sm:$0xff] }
  0x11   :  { %336 = vmatpush.msra.mxu1 %v257_v27  ;;  %317 = vmatpush.msra.mxu0 %v240_v29  ;;  %v252_v47 = vld [vmem:[%s848_s1 + $0xa0] sm:$0xff]  ;;  %v235_v49 = vld [vmem:[%s848_s1 + $0x18] sm:$0xff]  ;;  %v22_v51 = vld [vmem:[%s847_s0 + $0x8] sm:$0xff] }
  0x12   :  { %377 = vmatpush.msra.mxu3 %v288_v30  ;;  %358 = vmatpush.msra.mxu2 %v271_v32  ;;  %v21_v50 = vld [vmem:[%s847_s0] sm:$0xff]  ;;  %v23_v52 = vld [vmem:[%s847_s0 + $0x10] sm:$0xff]  ;;  %v283_v53 = vld [vmem:[%s848_s1 + $0x198] sm:$0xff] }
  0x13   :  { %337 = vmatpush.msra.mxu1 %v256_v31  ;;  %318 = vmatpush.msra.mxu0 %v239_v33  ;;  %v251_v54 = vld [vmem:[%s848_s1 + $0x98] sm:$0xff]  ;;  %v25_v56 = vld [vmem:[%s847_s0 + $0x20] sm:$0xff]  ;;  %v26_v57 = vld [vmem:[%s847_s0 + $0x28] sm:$0xff] }
  0x14   :  { %378 = vmatpush.msra.mxu3 %v287_v34  ;;  %359 = vmatpush.msra.mxu2 %v270_v36  ;;  %v24_v55 = vld [vmem:[%s847_s0 + $0x18] sm:$0xff]  ;;  %v266_v58 = vld [vmem:[%s848_s1 + $0x110] sm:$0xff]  ;;  %v29_v62 = vld [vmem:[%s847_s0 + $0x40] sm:$0xff]  ;;  %v85_v63 = vadd.f32 %v25_v56, %v21_v50  ;;  %v98_v0 = vadd.f32 %v26_v57, %v22_v51 }
  0x15   :  { %338 = vmatpush.msra.mxu1 %v255_v35  ;;  %319 = vmatpush.msra.mxu0 %v238_v37  ;;  %v234_v59 = vld [vmem:[%s848_s1 + $0x10] sm:$0xff]  ;;  %v28_v61 = vld [vmem:[%s847_s0 + $0x38] sm:$0xff]  ;;  %v30_v3 = vld [vmem:[%s847_s0 + $0x48] sm:$0xff] }
  0x16   :  { %379 = vmatpush.msra.mxu3 %v286_v39  ;;  %360 = vmatpush.msra.mxu2 %v269_v38  ;;  %v27_v60 = vld [vmem:[%s847_s0 + $0x30] sm:$0xff]  ;;  %v32_v5 = vld [vmem:[%s847_s0 + $0x58] sm:$0xff]  ;;  %v124_v7 = vadd.f32 %v28_v61, %v24_v55  ;;  %v265_v8 = vld [vmem:[%s848_s1 + $0x108] sm:$0xff]  ;;  %v86_v13 = vadd.f32 %v85_v63, %v29_v62  ;;  %v99_v14 = vadd.f32 %v98_v0, %v30_v3 }
  0x17   :  { %339 = vmatpush.msra.mxu1 %v254_v41  ;;  %320 = vmatpush.msra.mxu0 %v237_v40  ;;  %v282_v1 = vld [vmem:[%s848_s1 + $0x190] sm:$0xff]  ;;  %v111_v6 = vadd.f32 %v27_v60, %v23_v52  ;;  %v233_v9 = vld [vmem:[%s848_s1 + $0x8] sm:$0xff]  ;;  %v33_v10 = vld [vmem:[%s847_s0 + $0x60] sm:$0xff] }
  0x18   :  { %380 = vmatpush.msra.mxu3 %v285_v43  ;;  %361 = vmatpush.msra.mxu2 %v268_v42  ;;  %v250_v2 = vld [vmem:[%s848_s1 + $0x90] sm:$0xff]  ;;  %v34_v11 = vld [vmem:[%s847_s0 + $0x68] sm:$0xff]  ;;  %v36_v16 = vld [vmem:[%s847_s0 + $0x78] sm:$0xff]  ;;  %v125_v20 = vadd.f32 %v124_v7, %v32_v5  ;;  %v87_v25 = vadd.f32 %v86_v13, %v33_v10 }
  0x19   :  { %340 = vmatpush.msra.mxu1 %v253_v45  ;;  %321 = vmatpush.msra.mxu0 %v236_v44  ;;  %v31_v4 = vld [vmem:[%s847_s0 + $0x50] sm:$0xff]  ;;  %v281_v15 = vld [vmem:[%s848_s1 + $0x188] sm:$0xff]  ;;  %v37_v17 = vld [vmem:[%s847_s0 + $0x80] sm:$0xff]  ;;  %v100_v26 = vadd.f32 %v99_v14, %v34_v11 }
  0x1a   :  { %381 = vmatpush.msra.mxu3 %v284_v46  ;;  %v35_v12 = vld [vmem:[%s847_s0 + $0x70] sm:$0xff]  ;;  %362 = vmatpush.msra.mxu2 %v267_v48  ;;  %v38_v18 = vld [vmem:[%s847_s0 + $0x88] sm:$0xff]  ;;  %v112_v19 = vadd.f32 %v111_v6, %v31_v4  ;;  %v264_v21 = vld [vmem:[%s848_s1 + $0x100] sm:$0xff]  ;;  %v126_v31 = vadd.f32 %v125_v20, %v36_v16  ;;  %v88_v35 = vadd.f32 %v87_v25, %v37_v17 }
  0x1b   :  { %341 = vmatpush.msra.mxu1 %v252_v47  ;;  %322 = vmatpush.msra.mxu0 %v235_v49  ;;  %v39_v22 = vld [vmem:[%s847_s0 + $0x90] sm:$0xff]  ;;  %v40_v23 = vld [vmem:[%s847_s0 + $0x98] sm:$0xff]  ;;  %v41_v24 = vld [vmem:[%s847_s0 + $0xa0] sm:$0xff]  ;;  %v101_v36 = vadd.f32 %v100_v26, %v38_v18 }
  0x1c   :  { %382 = vmatpush.msra.mxu3 %v283_v53  ;;  %363 = vmatpush.msra.mxu2 %v266_v58  ;;  %v42_v27 = vld [vmem:[%s847_s0 + $0xa8] sm:$0xff]  ;;  %v43_v28 = vld [vmem:[%s847_s0 + $0xb0] sm:$0xff]  ;;  %v44_v29 = vld [vmem:[%s847_s0 + $0xb8] sm:$0xff]  ;;  %v113_v30 = vadd.f32 %v112_v19, %v35_v12  ;;  %v127_v41 = vadd.f32 %v126_v31, %v40_v23  ;;  %v89_v45 = vadd.f32 %v88_v35, %v41_v24 }
  0x1d   :  { %342 = vmatpush.msra.mxu1 %v251_v54  ;;  %323 = vmatpush.msra.mxu0 %v234_v59  ;;  %v45_v32 = vld [vmem:[%s847_s0 + $0xc0] sm:$0xff]  ;;  %v46_v33 = vld [vmem:[%s847_s0 + $0xc8] sm:$0xff]  ;;  %v47_v34 = vld [vmem:[%s847_s0 + $0xd0] sm:$0xff]  ;;  %v102_v46 = vadd.f32 %v101_v36, %v42_v27 }
  0x1e   :  { %383 = vmatpush.msra.mxu3 %v282_v1  ;;  %364 = vmatpush.msra.mxu2 %v265_v8  ;;  %v48_v37 = vld [vmem:[%s847_s0 + $0xd8] sm:$0xff]  ;;  %v49_v38 = vld [vmem:[%s847_s0 + $0xe0] sm:$0xff]  ;;  %v50_v39 = vld [vmem:[%s847_s0 + $0xe8] sm:$0xff]  ;;  %v114_v40 = vadd.f32 %v113_v30, %v39_v22  ;;  %v128_v51 = vadd.f32 %v127_v41, %v44_v29  ;;  %v90_v55 = vadd.f32 %v89_v45, %v45_v32 }
  0x1f   :  { %343 = vmatpush.msra.mxu1 %v250_v2  ;;  %324 = vmatpush.msra.mxu0 %v233_v9  ;;  %v51_v42 = vld [vmem:[%s847_s0 + $0xf0] sm:$0xff]  ;;  %v52_v43 = vld [vmem:[%s847_s0 + $0xf8] sm:$0xff]  ;;  %v53_v44 = vld [vmem:[%s847_s0 + $0x100] sm:$0xff]  ;;  %v103_v56 = vadd.f32 %v102_v46, %v46_v33 }
  0x20   :  { %384 = vmatpush.msra.mxu3 %v281_v15  ;;  %365 = vmatpush.msra.mxu2 %v264_v21  ;;  %v54_v47 = vld [vmem:[%s847_s0 + $0x108] sm:$0xff]  ;;  %v55_v48 = vld [vmem:[%s847_s0 + $0x110] sm:$0xff]  ;;  %v56_v49 = vld [vmem:[%s847_s0 + $0x118] sm:$0xff]  ;;  %v115_v50 = vadd.f32 %v114_v40, %v43_v28  ;;  %v129_v61 = vadd.f32 %v128_v51, %v48_v37  ;;  %v91_v3 = vadd.f32 %v90_v55, %v49_v38 }
  0x21   :  { %v57_v52 = vld [vmem:[%s847_s0 + $0x120] sm:$0xff]  ;;  %v58_v53 = vld [vmem:[%s847_s0 + $0x128] sm:$0xff]  ;;  %v59_v54 = vld [vmem:[%s847_s0 + $0x130] sm:$0xff]  ;;  %v104_v4 = vadd.f32 %v103_v56, %v50_v39 }
  0x22   :  { %v60_v57 = vld [vmem:[%s847_s0 + $0x138] sm:$0xff]  ;;  %v61_v58 = vld [vmem:[%s847_s0 + $0x140] sm:$0xff]  ;;  %v62_v59 = vld [vmem:[%s847_s0 + $0x148] sm:$0xff]  ;;  %v116_v60 = vadd.f32 %v115_v50, %v47_v34  ;;  %v137_v62 = vadd.f32 %v57_v52, %v53_v44  ;;  %v150_v63 = vadd.f32 %v58_v53, %v54_v47  ;;  %v163_v5 = vadd.f32 %v59_v54, %v55_v48 }
  0x23   :  { %v63_v0 = vld [vmem:[%s847_s0 + $0x150] sm:$0xff]  ;;  %v64_v1 = vld [vmem:[%s847_s0 + $0x158] sm:$0xff]  ;;  %v65_v2 = vld [vmem:[%s847_s0 + $0x160] sm:$0xff]  ;;  %v176_v6 = vadd.f32 %v60_v57, %v56_v49  ;;  %v130_v11 = vadd.f32 %v129_v61, %v52_v43  ;;  %v92_v16 = vrot.slane %v91_v3, 4  ;;  %v105_v17 = vrot.slane %v104_v4, 4 }
  0x24   :  { %v66_v7 = vld [vmem:[%s847_s0 + $0x168] sm:$0xff]  ;;  %v67_v8 = vld [vmem:[%s847_s0 + $0x170] sm:$0xff]  ;;  %v68_v9 = vld [vmem:[%s847_s0 + $0x178] sm:$0xff]  ;;  %v117_v10 = vadd.f32 %v116_v60, %v51_v42  ;;  %v138_v12 = vadd.f32 %v137_v62, %v61_v58  ;;  %v151_v13 = vadd.f32 %v150_v63, %v62_v59  ;;  %v164_v18 = vadd.f32 %v163_v5, %v63_v0 }
  0x25   :  { %v69_v14 = vld [vmem:[%s847_s0 + $0x180] sm:$0xff]  ;;  %v70_v15 = vld [vmem:[%s847_s0 + $0x188] sm:$0xff]  ;;  %v177_v19 = vadd.f32 %v176_v6, %v64_v1  ;;  %v71_v20 = vld [vmem:[%s847_s0 + $0x190] sm:$0xff]  ;;  %v131_v23 = vrot.slane %v130_v11, 4  ;;  %v93_v28 = vadd.f32 %v92_v16, %v91_v3  ;;  %v106_v29 = vadd.f32 %v105_v17, %v104_v4 }
  0x26   :  { %v72_v21 = vld [vmem:[%s847_s0 + $0x198] sm:$0xff]  ;;  %v118_v22 = vrot.slane %v117_v10, 4  ;;  %v139_v24 = vadd.f32 %v138_v12, %v65_v2  ;;  %v152_v25 = vadd.f32 %v151_v13, %v66_v7  ;;  %v73_v26 = vld [vmem:[%s847_s0 + $0x1a0] sm:$0xff]  ;;  %v74_v27 = vld [vmem:[%s847_s0 + $0x1a8] sm:$0xff]  ;;  %v165_v30 = vadd.f32 %v164_v18, %v67_v8 }
  0x27   :  { %v178_v31 = vadd.f32 %v177_v19, %v68_v9  ;;  %v75_v32 = vld [vmem:[%s847_s0 + $0x1b0] sm:$0xff]  ;;  %v76_v33 = vld [vmem:[%s847_s0 + $0x1b8] sm:$0xff]  ;;  %v132_v35 = vadd.f32 %v131_v23, %v130_v11  ;;  %v77_v38 = vld [vmem:[%s847_s0 + $0x1c0] sm:$0xff]  ;;  %v107_v40 = vrot.slane %v106_v29, 2 }
  0x28   :  { %v119_v34 = vadd.f32 %v118_v22, %v117_v10  ;;  %v140_v36 = vadd.f32 %v139_v24, %v69_v14  ;;  %v153_v37 = vadd.f32 %v152_v25, %v70_v15  ;;  %v78_v39 = vld [vmem:[%s847_s0 + $0x1c8] sm:$0xff]  ;;  %v166_v41 = vadd.f32 %v165_v30, %v71_v20  ;;  %v79_v43 = vld [vmem:[%s847_s0 + $0x1d0] sm:$0xff]  ;;  %v80_v44 = vld [vmem:[%s847_s0 + $0x1d8] sm:$0xff] }
  0x29   :  { %v179_v42 = vadd.f32 %v178_v31, %v72_v21  ;;  %v133_v46 = vrot.slane %v132_v35, 2  ;;  %v81_v49 = vld [vmem:[%s847_s0 + $0x1e0] sm:$0xff]  ;;  %v82_v50 = vld [vmem:[%s847_s0 + $0x1e8] sm:$0xff] }
  0x2a   :  { %v120_v45 = vrot.slane %v119_v34, 2  ;;  %v141_v47 = vadd.f32 %v140_v36, %v73_v26  ;;  %v154_v48 = vadd.f32 %v153_v37, %v74_v27  ;;  %v167_v51 = vadd.f32 %v166_v41, %v75_v32 }
  0x2b   :  { %v180_v52 = vadd.f32 %v179_v42, %v76_v33 }
  0x2c   :  { %8 = vsyncpa [#allocation4], 0  ;;  %v83_v53 = vld [vmem:[%s847_s0 + $0x1f0] sm:$0xff]  ;;  %v84_v54 = vld [vmem:[%s847_s0 + $0x1f8] sm:$0xff]  ;;  %v94_v55 = vrot.slane %v93_v28, 2  ;;  %v108_v56 = vadd.f32 %v107_v40, %v106_v29  ;;  %v142_v57 = vadd.f32 %v141_v47, %v77_v38  ;;  %v155_v58 = vadd.f32 %v154_v48, %v78_v39  ;;  %s436_s25 = smov [#allocation3]  }
  0x2d   :  { %v121_v59 = vadd.f32 %v120_v45, %v119_v34  ;;  %v134_v60 = vadd.f32 %v133_v46, %v132_v35  ;;  %v168_v61 = vadd.f32 %v167_v51, %v79_v43  ;;  %v181_v62 = vadd.f32 %v180_v52, %v80_v44  ;;  %v232_v3 = vld [vmem:[%s848_s1] sm:$0xff]  ;;  %v249_v4 = vld [vmem:[%s848_s1 + $0x88] sm:$0xff]  ;;  %s397_s26 = sshll.u32 %s436_s25, 4  ;;  %s399_s29 = sshll.u32 %s850_s3, 4  ;;  %s398_s26 = int_to_ptr.vmem [resolvable:$true] %s397_s26  ;;  %s400_s29 = int_to_ptr.hbm [resolvable:$true] %s399_s29 }
  0x2e   :  { %v143_v63 = vadd.f32 %v142_v57, %v81_v49  ;;  %v156_v0 = vadd.f32 %v155_v58, %v82_v50  ;;  %v280_v5 = vld [vmem:[%s848_s1 + $0x180] sm:$0xff]  ;;  %v95_v6 = vadd.f32 %v94_v55, %v93_v28  ;;  %v109_v7 = vrot.slane %v108_v56, 1  ;;  %325 = vmatpush.msra.mxu0 %v232_v3  ;;  %344 = vmatpush.msra.mxu1 %v249_v4 }
  0x2f   :  { %v169_v1 = vadd.f32 %v168_v61, %v83_v53  ;;  %v182_v2 = vadd.f32 %v181_v62, %v84_v54  ;;  %v248_v10 = vld [vmem:[%s848_s1 + $0x80] sm:$0xff]  ;;  %v122_v11 = vrot.slane %v121_v59, 1  ;;  %v135_v12 = vrot.slane %v134_v60, 1  ;;  %385 = vmatpush.msra.mxu3 %v280_v5 }
  0x30   :  { %v144_v8 = vrot.slane %v143_v63, 4  ;;  %v157_v9 = vrot.slane %v156_v0, 4  ;;  %345 = vmatpush.msra.mxu1 %v248_v10  ;;  %v96_v19 = vrot.slane %v95_v6, 1  ;;  %v110_v20 = vadd.f32 %v109_v7, %v108_v56  ;;  %v409_v61 = vld [vmem:[%s849_s2] ss:$0 sm:$0xff] }
  0x31   :  { %v170_v13 = vrot.slane %v169_v1, 4  ;;  %v183_v14 = vrot.slane %v182_v2, 4  ;;  %v123_v23 = vadd.f32 %v122_v11, %v121_v59  ;;  %v136_v24 = vadd.f32 %v135_v12, %v134_v60 }
  0x32   :  { %v145_v15 = vadd.f32 %v144_v8, %v143_v63  ;;  %v158_v16 = vadd.f32 %v157_v9, %v156_v0  ;;  %v97_v31 = vadd.f32 %v96_v19, %v95_v6  ;;  %v197_v34 = vrot.slane %v110_v20, 6 }
  0x33   :  { %v171_v17 = vadd.f32 %v170_v13, %v169_v1  ;;  %v184_v18 = vadd.f32 %v183_v14, %v182_v2  ;;  %v198_v37 = vrot.slane %v123_v23, 4  ;;  %v199_v38 = vrot.slane %v136_v24, 2 }
  0x34   :  { %v146_v21 = vrot.slane %v145_v15, 2  ;;  %v159_v22 = vrot.slane %v158_v16, 2  ;;  %vm203_vm0 = vcmask 1041408   ;;  %vm205_vm1 = vcmask 1045508  }
  0x35   :  { %v172_v25 = vrot.slane %v171_v17, 2  ;;  %v185_v26 = vrot.slane %v184_v18, 2  ;;  %vm207_vm2 = vcmask 1043456   ;;  %v204_v46 = vsel %vm203_vm0, %v97_v31, %v197_v34 }
  0x36   :  { %v147_v27 = vadd.f32 %v146_v21, %v145_v15  ;;  %v160_v28 = vadd.f32 %v159_v22, %v158_v16  ;;  %v206_v47 = vsel %vm205_vm1, %v198_v37, %v199_v38  ;;  %vm217_vm3 = vcmask 1041409  }
  0x37   :  { %v173_v29 = vadd.f32 %v172_v25, %v171_v17  ;;  %v186_v30 = vadd.f32 %v185_v26, %v184_v18  ;;  %v208_v50 = vsel %vm207_vm2, %v204_v46, %v206_v47  ;;  %vm219_vm4 = vcmask 1043459  }
  0x38   :  { %v148_v32 = vrot.slane %v147_v27, 1  ;;  %v161_v33 = vrot.slane %v160_v28, 1  ;;  %vm221_vm5 = vcmask 1045509   ;;  %vm223_vm6 = vcmask 1047559  }
  0x39   :  { %v174_v35 = vrot.slane %v173_v29, 1  ;;  %v187_v36 = vrot.slane %v186_v30, 1  ;;  %vm390_vm7 = vcmask 254976  }
  0x3a   :  { %v149_v39 = vadd.f32 %v148_v32, %v147_v27  ;;  %v162_v40 = vadd.f32 %v161_v33, %v160_v28 }
  0x3b   :  { %v175_v41 = vadd.f32 %v174_v35, %v173_v29  ;;  %v188_v42 = vadd.f32 %v187_v36, %v186_v30 }
  0x3c   :  { %v200_v43 = vrot.slane %v162_v40, 6 }
  0x3d   :  { %v201_v44 = vrot.slane %v175_v41, 4  ;;  %v202_v45 = vrot.slane %v188_v42, 2 }
  0x3e   :  { %v209_v48 = vsel %vm203_vm0, %v149_v39, %v200_v43 }
  0x3f   :  { %v210_v49 = vsel %vm205_vm1, %v201_v44, %v202_v45 }
  0x40   :  { %v211_v51 = vsel %vm207_vm2, %v209_v48, %v210_v49 }
  0x41   :  { %v216_v52 = vrot.slane %v211_v51, 7 }
  0x43   :  { %v218_v53 = vsel %vm217_vm3, %v216_v52, %v208_v50 }
  0x44   :  { %v220_v54 = vsel %vm219_vm4, %v216_v52, %v218_v53 }
  0x45   :  { %v222_v55 = vsel %vm221_vm5, %v216_v52, %v220_v54 }
  0x46   :  { %v224_v56 = vsel %vm223_vm6, %v216_v52, %v222_v55 }
  0x47   :  { %301 = vst [vmem:[#allocation1] ss:$4 sm:$0xff] %v224_v56 }
  0x4e   :  { %v304_v57 = vld.sshfl [vmem:[#allocation1 + $0x10] sm:$0xff pattern:$0x73625140]  ;;  %v302_v58 = vld.sshfl [vmem:[#allocation1] sm:$0xff pattern:$0x73625140] }
  0x4f   :  { %366 = vmatmul.f32.vlgmr.msra.gmra.mxu2 %v304_v57  ;;  %326 = vmatmul.f32.vlgmr.msra.gmra.mxu0 %v302_v58  ;;  %v305_v59 = vld.sshfl [vmem:[#allocation1 + $0x18] sm:$0xff pattern:$0x73625140]  ;;  %v303_v60 = vld.sshfl [vmem:[#allocation1 + $0x8] sm:$0xff pattern:$0x73625140] }
  0x50   :  { %386 = vmatmul.f32.vlgmr.msra.gmra.mxu3 %v305_v59  ;;  %346 = vmatmul.f32.vlgmr.msra.gmra.mxu1 %v303_v60 }
  0xcc   :  { %v327_v62 = vpop.f32.mrf.mxu0 }
  0xcd   :  { %v328_v63 = vadd.f32 %v409_v61, %v327_v62  ;;  %v347_v0 = vpop.f32.mrf.mxu1 }
  0xcf   :  { %v348_v1 = vadd.f32 %v347_v0, %v328_v63 }
  0xd2   :  { %v367_v2 = vpop.f32.mrf.mxu2 }
  0xd3   :  { %v368_v3 = vadd.f32 %v367_v2, %v348_v1  ;;  %v387_v4 = vpop.f32.mrf.mxu3 }
  0xd5   :  { %v388_v5 = vadd.f32 %v387_v4, %v368_v3 }
  0xd7   :  { %391 = vst.msk [vmem:[#allocation3] sm:$0x3] %vm390_vm7, %v388_v5 }
  0xd8   :  { %402 = dma.vmem_to_hbm [thread:$0]  %s398_s26, 32, %s400_s29, [#allocation4]  }
  0xd9   :  { %434 = dma.done.wait [#allocation4], 32  }
  0xda   :  { %435 = vsyncadd [#allocation4], 4294967264 }
  0xdb   :  { %407 = vsyncpa [#allocation4], 1 }

</bundles_post_ra>
